<compile_context>
chip_gen: v7x
topology: tpu7x:2x2x1
jax: 0.10.0
libtpu: 0.0.40
codegen_flags: <defaults>
</compile_context>

<pallas_src>
import functools
import math

import jax
import jax.numpy as jnp
import numpy as np
from jax import lax
from jax.experimental import pallas as pl
from jax.experimental.pallas import tpu as pltpu


def _round_up(x, m):
    return ((x + m - 1) // m) * m


def _flash_attention_kernel(vl_ref, q_ref, k_ref, v_ref, o_ref,
                            m_sc, l_sc, acc_sc, *, scale, per_row_vl):
    # vl_ref : SMEM (B,) int32 per-batch valid length   (per_row_vl=False)
    #          or VMEM (Bb, tq, 1) int32 per-row length (per_row_vl=True)
    # q_ref  : (Bb, tq, D)     k_ref: (Bb, tk, D)     v_ref: (Bb, tk, Dv_pad)
    # o_ref  : (Bb, tq, Dv_pad)
    # m_sc/l_sc : (Bb, tq, 1) f32     acc_sc : (Bb, tq, Dv_pad) f32
    b = pl.program_id(0)
    ki = pl.program_id(2)
    block_b, tq, _ = q_ref.shape
    tk = k_ref.shape[1]

    @pl.when(ki == 0)
    def _init():
        m_sc[...] = jnp.full_like(m_sc, -jnp.inf)
        l_sc[...] = jnp.zeros_like(l_sc)
        acc_sc[...] = jnp.zeros_like(acc_sc)

    # Global key/column index of this kv tile (int32, exact).
    col = lax.broadcasted_iota(jnp.int32, (tq, tk), 1) + ki * tk

    # Static unrolled loop over the batch elements packed into this block:
    # each iteration is an independent MXU matmul pair, amortizing grid-step
    # overhead for small shapes.
    for i in range(block_b):
        q = q_ref[i]                      # (tq, D)
        k = k_ref[i]                      # (tk, D)
        v = v_ref[i]                      # (tk, Dv_pad)

        # QK^T: contract last dims directly (transposed RHS fed to the MXU),
        # input dtype on the MXU, f32 accumulation.
        s = lax.dot_general(q, k, (((1,), (1,)), ((), ())),
                            preferred_element_type=jnp.float32)
        s = s * jnp.float32(scale)        # (tq, tk)

        if per_row_vl:
            vl = vl_ref[i]                # (tq, 1) int32
        else:
            vl = vl_ref[b * block_b + i]  # scalar int32 from SMEM
        # d2l masked_softmax: masked positions get -1e6 BEFORE softmax.
        s = jnp.where(col < vl, s, jnp.float32(-1e6))

        # Online (flash) softmax update.
        m_prev = m_sc[i]                                  # (tq, 1)
        m_new = jnp.maximum(m_prev, jnp.max(s, axis=-1, keepdims=True))
        alpha = jnp.exp(m_prev - m_new)
        p = jnp.exp(s - m_new)                            # (tq, tk) f32
        l_sc[i] = alpha * l_sc[i] + jnp.sum(p, axis=-1, keepdims=True)
        acc_sc[i] = alpha * acc_sc[i] + lax.dot_general(
            p.astype(v.dtype), v, (((1,), (0,)), ((), ())),
            preferred_element_type=jnp.float32)
        m_sc[i] = m_new

    @pl.when(ki == pl.num_programs(2) - 1)
    def _finalize():
        inv_l = pl.reciprocal(l_sc[...], approx=True)     # EUP slot
        o_ref[...] = (acc_sc[...] * inv_l).astype(o_ref.dtype)


def dot_product_attention(queries, keys, values, valid_lens=None):
    """Pallas implementation of d2l.DotProductAttention.forward (dropout=0)."""
    queries = jnp.asarray(queries)
    keys = jnp.asarray(keys)
    values = jnp.asarray(values)
    B, Q, D = queries.shape
    _, K, _ = keys.shape
    _, _, Dv = values.shape
    out_dtype = queries.dtype
    scale = 1.0 / math.sqrt(D)

    # Batch elements packed per grid step (largest divisor of B that is <= 8).
    block_b = 1
    for c in range(min(B, 8), 0, -1):
        if B % c == 0:
            block_b = c
            break

    # Sequence tiles: multiples of 8 (sublane), capped at 128 — conservative
    # for v7x's 64 MiB VMEM (double-buffered blocks stay under a few MiB).
    tq = min(_round_up(Q, 8), 128)
    tk = min(_round_up(K, 8), 128)
    q_pad = _round_up(Q, tq)
    k_pad = _round_up(K, tk)
    dv_pad = _round_up(Dv, 128)        # lane-dense output stores

    qp = queries if q_pad == Q else jnp.pad(queries, ((0, 0), (0, q_pad - Q), (0, 0)))
    kp = keys if k_pad == K else jnp.pad(keys, ((0, 0), (0, k_pad - K), (0, 0)))
    vp = values
    if k_pad != K or dv_pad != Dv:
        vp = jnp.pad(values, ((0, 0), (0, k_pad - K), (0, dv_pad - Dv)))

    grid = (B // block_b, q_pad // tq, k_pad // tk)

    # K/V index maps ignore the q-tile axis; kv is innermost; padded key
    # columns (col >= K) are masked because valid_len <= K.
    q_spec = pl.BlockSpec((block_b, tq, D), lambda b, qi, ki, *_: (b, qi, 0))
    k_spec = pl.BlockSpec((block_b, tk, D), lambda b, qi, ki, *_: (b, ki, 0))
    v_spec = pl.BlockSpec((block_b, tk, dv_pad), lambda b, qi, ki, *_: (b, ki, 0))
    o_spec = pl.BlockSpec((block_b, tq, dv_pad), lambda b, qi, ki, *_: (b, qi, 0))
    scratch = [
        pltpu.VMEM((block_b, tq, 1), jnp.float32),        # running max
        pltpu.VMEM((block_b, tq, 1), jnp.float32),        # running denom
        pltpu.VMEM((block_b, tq, dv_pad), jnp.float32),   # output accumulator
    ]

    if valid_lens is None or jnp.ndim(valid_lens) == 1:
        # Fast path: per-batch lengths live in SMEM via scalar prefetch.
        per_row = False
        if valid_lens is None:
            vl = jnp.full((B,), K, dtype=jnp.int32)
        else:
            vl = jnp.minimum(jnp.asarray(valid_lens).astype(jnp.int32), K)
        num_prefetch = 1
        in_specs = [q_spec, k_spec, v_spec]
    else:
        # Per-query lengths: small int32 (B, Q_pad, 1) VMEM side input.
        per_row = True
        vl = jnp.minimum(jnp.asarray(valid_lens).astype(jnp.int32), K)
        vl = vl.reshape(B, Q, 1)
        if q_pad != Q:
            vl = jnp.pad(vl, ((0, 0), (0, q_pad - Q), (0, 0)))
        num_prefetch = 0
        vl_spec = pl.BlockSpec((block_b, tq, 1), lambda b, qi, ki: (b, qi, 0))
        in_specs = [vl_spec, q_spec, k_spec, v_spec]

    kernel = functools.partial(_flash_attention_kernel,
                               scale=scale, per_row_vl=per_row)

    out = pl.pallas_call(
        kernel,
        out_shape=jax.ShapeDtypeStruct((B, q_pad, dv_pad), out_dtype),
        grid_spec=pltpu.PrefetchScalarGridSpec(
            num_scalar_prefetch=num_prefetch,
            grid=grid,
            in_specs=in_specs,
            out_specs=o_spec,
            scratch_shapes=scratch),
        compiler_params=pltpu.CompilerParams(
            dimension_semantics=("parallel", "parallel", "arbitrary")),
    )(vl, qp, kp, vp)

    return out[:, :Q, :Dv]


def _reference(queries, keys, values, valid_lens):
    d = queries.shape[-1]
    scores = jnp.einsum("bqd,bkd->bqk", queries, keys) / math.sqrt(d)
    if valid_lens is not None:
        vl = jnp.asarray(valid_lens)
        if vl.ndim == 1:
            vl = vl[:, None]
        col = jnp.arange(scores.shape[-1])[None, None, :]
        scores = jnp.where(col < vl[..., None], scores, -1e6)
    w = jax.nn.softmax(scores, axis=-1)
    return jnp.einsum("bqk,bkv->bqv", w, values)


if __name__ == "__main__":
    key = jax.random.PRNGKey(0)
    k1, k2, k3, k4, k5, k6 = jax.random.split(key, 6)

    # --- Test 1: small f32, 1-D valid_lens (SMEM scalar-prefetch path) ---
    B, Q, K, D, Dv = 2, 8, 8, 32, 16
    q = jax.random.normal(k1, (B, Q, D), dtype=jnp.float32)
    k_ = jax.random.normal(k2, (B, K, D), dtype=jnp.float32)
    v = jax.random.normal(k3, (B, K, Dv), dtype=jnp.float32)
    vl = jnp.array([3, 6], dtype=jnp.int32)
    out = jax.block_until_ready(dot_product_attention(q, k_, v, vl))
    ref = _reference(q, k_, v, vl)
    np.testing.assert_allclose(np.asarray(out), np.asarray(ref),
                               rtol=1e-2, atol=1e-2)

    # --- Test 2: f32, 2-D per-row valid_lens, K spans multiple kv tiles
    #     (exercises online softmax across tiles + seq/lane padding) ---
    B2, Q2, K2, D2, Dv2 = 2, 20, 160, 32, 16
    q2 = jax.random.normal(k4, (B2, Q2, D2), dtype=jnp.float32)
    k2_ = jax.random.normal(k5, (B2, K2, D2), dtype=jnp.float32)
    v2 = jax.random.normal(k6, (B2, K2, Dv2), dtype=jnp.float32)
    vl2 = jax.random.randint(k1, (B2, Q2), 1, K2 + 1).astype(jnp.int32)
    out2 = jax.block_until_ready(dot_product_attention(q2, k2_, v2, vl2))
    ref2 = _reference(q2, k2_, v2, vl2)
    np.testing.assert_allclose(np.asarray(out2), np.asarray(ref2),
                               rtol=1e-2, atol=1e-2)

    # --- Test 3: bf16 inputs (native MXU dtype), no mask ---
    B3, Q3, K3, D3, Dv3 = 2, 128, 128, 64, 64
    q3 = jax.random.normal(k2, (B3, Q3, D3), dtype=jnp.float32).astype(jnp.bfloat16)
    k3_ = jax.random.normal(k3, (B3, K3, D3), dtype=jnp.float32).astype(jnp.bfloat16)
    v3 = jax.random.normal(k4, (B3, K3, Dv3), dtype=jnp.float32).astype(jnp.bfloat16)
    out3 = jax.block_until_ready(dot_product_attention(q3, k3_, v3, None))
    ref3 = _reference(q3.astype(jnp.float32), k3_.astype(jnp.float32),
                      v3.astype(jnp.float32), None)
    np.testing.assert_allclose(np.asarray(out3.astype(jnp.float32)),
                               np.asarray(ref3), rtol=5e-2, atol=5e-2)

    print("KERNEL_OK")
</pallas_src>

<mosaic_0001>
module attributes {stable_mosaic.version = 11 : i64} {
  func.func @_flash_attention_kernel(%arg0: i32, %arg1: i32, %arg2: i32, %arg3: memref<2xi32, #tpu.memory_space<smem>>, %arg4: memref<2x8x32xf32, #tpu.memory_space<vmem>>, %arg5: memref<2x8x32xf32, #tpu.memory_space<vmem>>, %arg6: memref<2x8x128xf32, #tpu.memory_space<vmem>>, %arg7: memref<2x8x128xf32, #tpu.memory_space<vmem>>, %arg8: memref<2x8x1xf32, #tpu.memory_space<vmem>>, %arg9: memref<2x8x1xf32, #tpu.memory_space<vmem>>, %arg10: memref<2x8x128xf32, #tpu.memory_space<vmem>>) attributes {dimension_semantics = [#tpu.dimension_semantics<parallel>, #tpu.dimension_semantics<parallel>, #tpu.dimension_semantics<arbitrary>], iteration_bounds = array<i64: 1, 1, 1>, scalar_prefetch = 1 : i64, scratch_operands = 3 : i64, tpu.core_type = #tpu.core_type<tc>, window_params = [{transform_indices = @transform_0, window_bounds = array<i64: 2, 8, 32>}, {transform_indices = @transform_1, window_bounds = array<i64: 2, 8, 32>}, {transform_indices = @transform_2, window_bounds = array<i64: 2, 8, 128>}, {transform_indices = @transform_3, window_bounds = array<i64: 2, 8, 128>}]} {
    %c0_i32 = arith.constant 0 : i32
    %0 = arith.cmpi eq, %arg2, %c0_i32 : i32
    %1 = arith.extui %0 : i1 to i32
    %c0_i32_0 = arith.constant 0 : i32
    %2 = arith.cmpi ne, %1, %c0_i32_0 : i32
    scf.if %2 {
      %cst_68 = arith.constant 0xFF800000 : f32
      %106 = vector.broadcast %cst_68 : f32 to vector<2x8x1xf32>
      %c0_69 = arith.constant 0 : index
      %c0_70 = arith.constant 0 : index
      %c0_71 = arith.constant 0 : index
      %107 = vector.load %arg8[%c0_69, %c0_70, %c0_71] : memref<2x8x1xf32, #tpu.memory_space<vmem>>, vector<2x8x1xf32>
      tpu.vector_store %arg8[%c0_69, %c0_70, %c0_71], %106 {strides = array<i32>} : memref<2x8x1xf32, #tpu.memory_space<vmem>>, vector<2x8x1xf32>,
      %cst_72 = arith.constant 0.000000e+00 : f32
      %108 = vector.broadcast %cst_72 : f32 to vector<2x8x1xf32>
      %c0_73 = arith.constant 0 : index
      %c0_74 = arith.constant 0 : index
      %c0_75 = arith.constant 0 : index
      %109 = vector.load %arg9[%c0_73, %c0_74, %c0_75] : memref<2x8x1xf32, #tpu.memory_space<vmem>>, vector<2x8x1xf32>
      tpu.vector_store %arg9[%c0_73, %c0_74, %c0_75], %108 {strides = array<i32>} : memref<2x8x1xf32, #tpu.memory_space<vmem>>, vector<2x8x1xf32>,
      %cst_76 = arith.constant 0.000000e+00 : f32
      %110 = vector.broadcast %cst_76 : f32 to vector<2x8x128xf32>
      %c0_77 = arith.constant 0 : index
      %c0_78 = arith.constant 0 : index
      %c0_79 = arith.constant 0 : index
      %111 = vector.load %arg10[%c0_77, %c0_78, %c0_79] : memref<2x8x128xf32, #tpu.memory_space<vmem>>, vector<2x8x128xf32>
      tpu.vector_store %arg10[%c0_77, %c0_78, %c0_79], %110 {strides = array<i32>} : memref<2x8x128xf32, #tpu.memory_space<vmem>>, vector<2x8x128xf32>,
    } else {
    }
    %3 = tpu.iota {dimensions = array<i32: 1>} : vector<8x8xi32>
    %c8_i32 = arith.constant 8 : i32
    %4 = arith.muli %arg2, %c8_i32 : i32
    %5 = vector.broadcast %4 : i32 to vector<8x8xi32>
    %6 = arith.addi %3, %5 : vector<8x8xi32>
    %c0 = arith.constant 0 : index
    %c0_1 = arith.constant 0 : index
    %c0_2 = arith.constant 0 : index
    %7 = vector.load %arg4[%c0, %c0_1, %c0_2] : memref<2x8x32xf32, #tpu.memory_space<vmem>>, vector<1x8x32xf32>
    %8 = vector.shape_cast %7 : vector<1x8x32xf32> to vector<8x32xf32>
    %c0_3 = arith.constant 0 : index
    %c0_4 = arith.constant 0 : index
    %c0_5 = arith.constant 0 : index
    %9 = vector.load %arg5[%c0_3, %c0_4, %c0_5] : memref<2x8x32xf32, #tpu.memory_space<vmem>>, vector<1x8x32xf32>
    %10 = vector.shape_cast %9 : vector<1x8x32xf32> to vector<8x32xf32>
    %c0_6 = arith.constant 0 : index
    %c0_7 = arith.constant 0 : index
    %c0_8 = arith.constant 0 : index
    %11 = vector.load %arg6[%c0_6, %c0_7, %c0_8] : memref<2x8x128xf32, #tpu.memory_space<vmem>>, vector<1x8x128xf32>
    %12 = vector.shape_cast %11 : vector<1x8x128xf32> to vector<8x128xf32>
    %cst = arith.constant dense<0.000000e+00> : vector<8x8xf32>
    %13 = tpu.matmul %8, %10, %cst {dimension_numbers = #tpu.dot_dimension_numbers<[1], [1], [0], [0], [0, 0, 1, 0], [], []>} : vector<8x32xf32>, vector<8x32xf32>, vector<8x8xf32> -> vector<8x8xf32>
    %cst_9 = arith.constant 0.176776692 : f32
    %14 = vector.broadcast %cst_9 : f32 to vector<8x8xf32>
    %15 = arith.mulf %13, %14 : vector<8x8xf32>
    %c2_i32 = arith.constant 2 : i32
    %16 = arith.muli %arg0, %c2_i32 : i32
    %c0_i32_10 = arith.constant 0 : i32
    %17 = arith.addi %16, %c0_i32_10 : i32
    %18 = arith.index_cast %17 : i32 to index
    %19 = memref.load %arg3[%18] : memref<2xi32, #tpu.memory_space<smem>>
    %20 = vector.broadcast %19 : i32 to vector<8x8xi32>
    %21 = arith.cmpi slt, %6, %20 : vector<8x8xi32>
    %cst_11 = arith.constant -1.000000e+06 : f32
    %22 = vector.broadcast %cst_11 : f32 to vector<8x8xf32>
    %23 = arith.select %21, %15, %22 : vector<8x8xi1>, vector<8x8xf32>
    %c0_12 = arith.constant 0 : index
    %c0_13 = arith.constant 0 : index
    %c0_14 = arith.constant 0 : index
    %24 = vector.load %arg8[%c0_12, %c0_13, %c0_14] : memref<2x8x1xf32, #tpu.memory_space<vmem>>, vector<1x8x1xf32>
    %25 = vector.shape_cast %24 : vector<1x8x1xf32> to vector<8x1xf32>
    %cst_15 = arith.constant dense<0xFF800000> : vector<8xf32>
    %26 = vector.multi_reduction <maximumf>, %23, %cst_15 [1] : vector<8x8xf32> to vector<8xf32>
    %27 = vector.shape_cast %26 : vector<8xf32> to vector<8x1xf32>
    %28 = arith.maximumf %25, %27 : vector<8x1xf32>
    %29 = arith.subf %25, %28 : vector<8x1xf32>
    %30 = math.exp %29 : vector<8x1xf32>
    %31 = vector.broadcast %28 : vector<8x1xf32> to vector<8x8xf32>
    %32 = arith.subf %23, %31 : vector<8x8xf32>
    %33 = math.exp %32 : vector<8x8xf32>
    %c0_16 = arith.constant 0 : index
    %c0_17 = arith.constant 0 : index
    %c0_18 = arith.constant 0 : index
    %34 = vector.load %arg9[%c0_16, %c0_17, %c0_18] : memref<2x8x1xf32, #tpu.memory_space<vmem>>, vector<1x8x1xf32>
    %35 = vector.shape_cast %34 : vector<1x8x1xf32> to vector<8x1xf32>
    %36 = arith.mulf %30, %35 : vector<8x1xf32>
    %cst_19 = arith.constant dense<0.000000e+00> : vector<8xf32>
    %37 = vector.multi_reduction <add>, %33, %cst_19 [1] : vector<8x8xf32> to vector<8xf32>
    %38 = vector.shape_cast %37 : vector<8xf32> to vector<8x1xf32>
    %39 = arith.addf %36, %38 : vector<8x1xf32>
    %c0_20 = arith.constant 0 : index
    %c0_21 = arith.constant 0 : index
    %c0_22 = arith.constant 0 : index
    %40 = vector.load %arg9[%c0_20, %c0_21, %c0_22] : memref<2x8x1xf32, #tpu.memory_space<vmem>>, vector<1x8x1xf32>
    %41 = vector.shape_cast %40 : vector<1x8x1xf32> to vector<8x1xf32>
    %42 = vector.shape_cast %39 : vector<8x1xf32> to vector<1x8x1xf32>
    tpu.vector_store %arg9[%c0_20, %c0_21, %c0_22], %42 {strides = array<i32>} : memref<2x8x1xf32, #tpu.memory_space<vmem>>, vector<1x8x1xf32>,
    %c0_23 = arith.constant 0 : index
    %c0_24 = arith.constant 0 : index
    %c0_25 = arith.constant 0 : index
    %43 = vector.load %arg10[%c0_23, %c0_24, %c0_25] : memref<2x8x128xf32, #tpu.memory_space<vmem>>, vector<1x8x128xf32>
    %44 = vector.shape_cast %43 : vector<1x8x128xf32> to vector<8x128xf32>
    %45 = vector.broadcast %30 : vector<8x1xf32> to vector<8x128xf32>
    %46 = arith.mulf %45, %44 : vector<8x128xf32>
    %cst_26 = arith.constant dense<0.000000e+00> : vector<8x128xf32>
    %47 = tpu.matmul %33, %12, %cst_26 {dimension_numbers = #tpu.dot_dimension_numbers<[1], [0], [0], [1], [0, 0, 1, 1], [], []>} : vector<8x8xf32>, vector<8x128xf32>, vector<8x128xf32> -> vector<8x128xf32>
    %48 = arith.addf %46, %47 : vector<8x128xf32>
    %c0_27 = arith.constant 0 : index
    %c0_28 = arith.constant 0 : index
    %c0_29 = arith.constant 0 : index
    %49 = vector.load %arg10[%c0_27, %c0_28, %c0_29] : memref<2x8x128xf32, #tpu.memory_space<vmem>>, vector<1x8x128xf32>
    %50 = vector.shape_cast %49 : vector<1x8x128xf32> to vector<8x128xf32>
    %51 = vector.shape_cast %48 : vector<8x128xf32> to vector<1x8x128xf32>
    tpu.vector_store %arg10[%c0_27, %c0_28, %c0_29], %51 {strides = array<i32>} : memref<2x8x128xf32, #tpu.memory_space<vmem>>, vector<1x8x128xf32>,
    %c0_30 = arith.constant 0 : index
    %c0_31 = arith.constant 0 : index
    %c0_32 = arith.constant 0 : index
    %52 = vector.load %arg8[%c0_30, %c0_31, %c0_32] : memref<2x8x1xf32, #tpu.memory_space<vmem>>, vector<1x8x1xf32>
    %53 = vector.shape_cast %52 : vector<1x8x1xf32> to vector<8x1xf32>
    %54 = vector.shape_cast %28 : vector<8x1xf32> to vector<1x8x1xf32>
    tpu.vector_store %arg8[%c0_30, %c0_31, %c0_32], %54 {strides = array<i32>} : memref<2x8x1xf32, #tpu.memory_space<vmem>>, vector<1x8x1xf32>,
    %c1 = arith.constant 1 : index
    %c0_33 = arith.constant 0 : index
    %c0_34 = arith.constant 0 : index
    %55 = vector.load %arg4[%c1, %c0_33, %c0_34] : memref<2x8x32xf32, #tpu.memory_space<vmem>>, vector<1x8x32xf32>
    %56 = vector.shape_cast %55 : vector<1x8x32xf32> to vector<8x32xf32>
    %c1_35 = arith.constant 1 : index
    %c0_36 = arith.constant 0 : index
    %c0_37 = arith.constant 0 : index
    %57 = vector.load %arg5[%c1_35, %c0_36, %c0_37] : memref<2x8x32xf32, #tpu.memory_space<vmem>>, vector<1x8x32xf32>
    %58 = vector.shape_cast %57 : vector<1x8x32xf32> to vector<8x32xf32>
    %c1_38 = arith.constant 1 : index
    %c0_39 = arith.constant 0 : index
    %c0_40 = arith.constant 0 : index
    %59 = vector.load %arg6[%c1_38, %c0_39, %c0_40] : memref<2x8x128xf32, #tpu.memory_space<vmem>>, vector<1x8x128xf32>
    %60 = vector.shape_cast %59 : vector<1x8x128xf32> to vector<8x128xf32>
    %cst_41 = arith.constant dense<0.000000e+00> : vector<8x8xf32>
    %61 = tpu.matmul %56, %58, %cst_41 {dimension_numbers = #tpu.dot_dimension_numbers<[1], [1], [0], [0], [0, 0, 1, 0], [], []>} : vector<8x32xf32>, vector<8x32xf32>, vector<8x8xf32> -> vector<8x8xf32>
    %cst_42 = arith.constant 0.176776692 : f32
    %62 = vector.broadcast %cst_42 : f32 to vector<8x8xf32>
    %63 = arith.mulf %61, %62 : vector<8x8xf32>
    %c2_i32_43 = arith.constant 2 : i32
    %64 = arith.muli %arg0, %c2_i32_43 : i32
    %c1_i32 = arith.constant 1 : i32
    %65 = arith.addi %64, %c1_i32 : i32
    %66 = arith.index_cast %65 : i32 to index
    %67 = memref.load %arg3[%66] : memref<2xi32, #tpu.memory_space<smem>>
    %68 = vector.broadcast %67 : i32 to vector<8x8xi32>
    %69 = arith.cmpi slt, %6, %68 : vector<8x8xi32>
    %cst_44 = arith.constant -1.000000e+06 : f32
    %70 = vector.broadcast %cst_44 : f32 to vector<8x8xf32>
    %71 = arith.select %69, %63, %70 : vector<8x8xi1>, vector<8x8xf32>
    %c1_45 = arith.constant 1 : index
    %c0_46 = arith.constant 0 : index
    %c0_47 = arith.constant 0 : index
    %72 = vector.load %arg8[%c1_45, %c0_46, %c0_47] : memref<2x8x1xf32, #tpu.memory_space<vmem>>, vector<1x8x1xf32>
    %73 = vector.shape_cast %72 : vector<1x8x1xf32> to vector<8x1xf32>
    %cst_48 = arith.constant dense<0xFF800000> : vector<8xf32>
    %74 = vector.multi_reduction <maximumf>, %71, %cst_48 [1] : vector<8x8xf32> to vector<8xf32>
    %75 = vector.shape_cast %74 : vector<8xf32> to vector<8x1xf32>
    %76 = arith.maximumf %73, %75 : vector<8x1xf32>
    %77 = arith.subf %73, %76 : vector<8x1xf32>
    %78 = math.exp %77 : vector<8x1xf32>
    %79 = vector.broadcast %76 : vector<8x1xf32> to vector<8x8xf32>
    %80 = arith.subf %71, %79 : vector<8x8xf32>
    %81 = math.exp %80 : vector<8x8xf32>
    %c1_49 = arith.constant 1 : index
    %c0_50 = arith.constant 0 : index
    %c0_51 = arith.constant 0 : index
    %82 = vector.load %arg9[%c1_49, %c0_50, %c0_51] : memref<2x8x1xf32, #tpu.memory_space<vmem>>, vector<1x8x1xf32>
    %83 = vector.shape_cast %82 : vector<1x8x1xf32> to vector<8x1xf32>
    %84 = arith.mulf %78, %83 : vector<8x1xf32>
    %cst_52 = arith.constant dense<0.000000e+00> : vector<8xf32>
    %85 = vector.multi_reduction <add>, %81, %cst_52 [1] : vector<8x8xf32> to vector<8xf32>
    %86 = vector.shape_cast %85 : vector<8xf32> to vector<8x1xf32>
    %87 = arith.addf %84, %86 : vector<8x1xf32>
    %c1_53 = arith.constant 1 : index
    %c0_54 = arith.constant 0 : index
    %c0_55 = arith.constant 0 : index
    %88 = vector.load %arg9[%c1_53, %c0_54, %c0_55] : memref<2x8x1xf32, #tpu.memory_space<vmem>>, vector<1x8x1xf32>
    %89 = vector.shape_cast %88 : vector<1x8x1xf32> to vector<8x1xf32>
    %90 = vector.shape_cast %87 : vector<8x1xf32> to vector<1x8x1xf32>
    tpu.vector_store %arg9[%c1_53, %c0_54, %c0_55], %90 {strides = array<i32>} : memref<2x8x1xf32, #tpu.memory_space<vmem>>, vector<1x8x1xf32>,
    %c1_56 = arith.constant 1 : index
    %c0_57 = arith.constant 0 : index
    %c0_58 = arith.constant 0 : index
    %91 = vector.load %arg10[%c1_56, %c0_57, %c0_58] : memref<2x8x128xf32, #tpu.memory_space<vmem>>, vector<1x8x128xf32>
    %92 = vector.shape_cast %91 : vector<1x8x128xf32> to vector<8x128xf32>
    %93 = vector.broadcast %78 : vector<8x1xf32> to vector<8x128xf32>
    %94 = arith.mulf %93, %92 : vector<8x128xf32>
    %cst_59 = arith.constant dense<0.000000e+00> : vector<8x128xf32>
    %95 = tpu.matmul %81, %60, %cst_59 {dimension_numbers = #tpu.dot_dimension_numbers<[1], [0], [0], [1], [0, 0, 1, 1], [], []>} : vector<8x8xf32>, vector<8x128xf32>, vector<8x128xf32> -> vector<8x128xf32>
    %96 = arith.addf %94, %95 : vector<8x128xf32>
    %c1_60 = arith.constant 1 : index
    %c0_61 = arith.constant 0 : index
    %c0_62 = arith.constant 0 : index
    %97 = vector.load %arg10[%c1_60, %c0_61, %c0_62] : memref<2x8x128xf32, #tpu.memory_space<vmem>>, vector<1x8x128xf32>
    %98 = vector.shape_cast %97 : vector<1x8x128xf32> to vector<8x128xf32>
    %99 = vector.shape_cast %96 : vector<8x128xf32> to vector<1x8x128xf32>
    tpu.vector_store %arg10[%c1_60, %c0_61, %c0_62], %99 {strides = array<i32>} : memref<2x8x128xf32, #tpu.memory_space<vmem>>, vector<1x8x128xf32>,
    %c1_63 = arith.constant 1 : index
    %c0_64 = arith.constant 0 : index
    %c0_65 = arith.constant 0 : index
    %100 = vector.load %arg8[%c1_63, %c0_64, %c0_65] : memref<2x8x1xf32, #tpu.memory_space<vmem>>, vector<1x8x1xf32>
    %101 = vector.shape_cast %100 : vector<1x8x1xf32> to vector<8x1xf32>
    %102 = vector.shape_cast %76 : vector<8x1xf32> to vector<1x8x1xf32>
    tpu.vector_store %arg8[%c1_63, %c0_64, %c0_65], %102 {strides = array<i32>} : memref<2x8x1xf32, #tpu.memory_space<vmem>>, vector<1x8x1xf32>,
    %c0_i32_66 = arith.constant 0 : i32
    %103 = arith.cmpi eq, %arg2, %c0_i32_66 : i32
    %104 = arith.extui %103 : i1 to i32
    %c0_i32_67 = arith.constant 0 : i32
    %105 = arith.cmpi ne, %104, %c0_i32_67 : i32
    scf.if %105 {
      %c0_68 = arith.constant 0 : index
      %c0_69 = arith.constant 0 : index
      %c0_70 = arith.constant 0 : index
      %106 = vector.load %arg9[%c0_68, %c0_69, %c0_70] : memref<2x8x1xf32, #tpu.memory_space<vmem>>, vector<2x8x1xf32>
      %107 = tpu.reciprocal %106 {approx = true} : vector<2x8x1xf32> -> vector<2x8x1xf32>
      %c0_71 = arith.constant 0 : index
      %c0_72 = arith.constant 0 : index
      %c0_73 = arith.constant 0 : index
      %108 = vector.load %arg10[%c0_71, %c0_72, %c0_73] : memref<2x8x128xf32, #tpu.memory_space<vmem>>, vector<2x8x128xf32>
      %109 = vector.broadcast %107 : vector<2x8x1xf32> to vector<2x8x128xf32>
      %110 = arith.mulf %108, %109 : vector<2x8x128xf32>
      %c0_74 = arith.constant 0 : index
      %c0_75 = arith.constant 0 : index
      %c0_76 = arith.constant 0 : index
      %111 = vector.load %arg7[%c0_74, %c0_75, %c0_76] : memref<2x8x128xf32, #tpu.memory_space<vmem>>, vector<2x8x128xf32>
      tpu.vector_store %arg7[%c0_74, %c0_75, %c0_76], %110 {strides = array<i32>} : memref<2x8x128xf32, #tpu.memory_space<vmem>>, vector<2x8x128xf32>,
    } else {
    }
    return
  }
  func.func @transform_0(%arg0: i32, %arg1: i32, %arg2: i32, %arg3: memref<2xi32, #tpu.memory_space<smem>>) -> (i32, i32, i32) {
    %c0_i32 = arith.constant 0 : i32
    %c0_i32_0 = arith.constant 0 : i32
    return %arg0, %arg1, %c0_i32 : i32, i32, i32
  }
  func.func @transform_1(%arg0: i32, %arg1: i32, %arg2: i32, %arg3: memref<2xi32, #tpu.memory_space<smem>>) -> (i32, i32, i32) {
    %c0_i32 = arith.constant 0 : i32
    %c0_i32_0 = arith.constant 0 : i32
    return %arg0, %arg2, %c0_i32 : i32, i32, i32
  }
  func.func @transform_2(%arg0: i32, %arg1: i32, %arg2: i32, %arg3: memref<2xi32, #tpu.memory_space<smem>>) -> (i32, i32, i32) {
    %c0_i32 = arith.constant 0 : i32
    %c0_i32_0 = arith.constant 0 : i32
    return %arg0, %arg2, %c0_i32 : i32, i32, i32
  }
  func.func @transform_3(%arg0: i32, %arg1: i32, %arg2: i32, %arg3: memref<2xi32, #tpu.memory_space<smem>>) -> (i32, i32, i32) {
    %c0_i32 = arith.constant 0 : i32
    %c0_i32_0 = arith.constant 0 : i32
    return %arg0, %arg1, %c0_i32 : i32, i32, i32
  }
}

</mosaic_0001>

<bundles_post_ra>
// kernel: tpu_custom_call.1
= control target key start
LH: loop header
LB: loop body
LE: loop exit
PB: predicated region body
PF: predicated region fallthrough
CT: control target
= control target key end

     0   :  { %s812_s0 = inlined_call_operand.hbm [shape: s32[2], index: 0, kind: input, shape index: {}]   ;;  %s813_s1 = inlined_call_operand.hbm [shape: f32[2,8,32], index: 1, kind: input, shape index: {}]   ;;  %s814_s2 = inlined_call_operand.hbm [shape: f32[2,8,32], index: 2, kind: input, shape index: {}]   ;;  %s815_s3 = inlined_call_operand.hbm [shape: f32[2,8,128], index: 3, kind: input, shape index: {}]   ;;  %s816_s4 = inlined_call_operand.hbm [shape: f32[2,8,128], index: 4, kind: output, shape index: {}]  }
   0x1   :  { %s569_s17 = scalar_lea.hbm %s812_s0, 16 }
   0x2   :  { %p570_p0 = scmp.ne.s32.totalorder %s812_s0, %s569_s17  ;;  %p573_p1 = scmp.lt.u32.totalorder %s569_s17, %s812_s0 }
   0x4   :  { %p575_p2 = pnand %p573_p1, %p570_p0 }
   0x6   :  { %578 = shalt.err (!%p575_p2)  }
   0x7   :  { %s675_s22 = smov [#allocation6]  }
   0x8   :  { %10 = dma.hbm_to_smem %s812_s0, 16, %s675_s22, [#allocation5] }
   0x9   :  { %667 = dma.done.wait [#allocation5], 16 }
   0xa   :  { %668 = vsyncadd [#allocation5], 4294967280 }
   0xb   :  { %12 = sfence }
   0xc   :  { %13 = vsyncpa [#allocation8], 0 }
   0xd   :  { %14 = vsyncpa [#allocation11], 0 }
   0xe   :  { %15 = vsyncpa [#allocation9], 0  ;;  %s676_s25 = smov [#allocation10]   ;;  %s677_s27 = smov [#allocation7]  }
   0xf   :  { %s33_s26 = sshll.u32 %s676_s25, 4  ;;  %s21_s28 = sshll.u32 %s677_s27, 4  ;;  %s34_s26 = int_to_ptr.vmem [resolvable:$true] %s33_s26  ;;  %s723_s28 = int_to_ptr.vmem [resolvable:$true] %s21_s28 }
  0x10   :  { %s579_s5 = scalar_lea.hbm %s814_s2, 256 }
  0x11   :  { %p580_p3 = scmp.ne.s32.totalorder %s814_s2, %s579_s5  ;;  %p583_p4 = scmp.lt.u32.totalorder %s579_s5, %s814_s2 }
  0x13   :  { %p585_p5 = pnand %p583_p4, %p580_p3 }
  0x15   :  { %588 = shalt.err (!%p585_p5)
}
  0x16   :  { %s589_s9 = scalar_lea.vmem %s34_s26, 256  ;;  %p594_p7 = scmp.lt.s32.totalorder %s34_s26, %s34_s26 }
  0x17   :  { %p590_p6 = scmp.ne.s32.totalorder %s34_s26, %s589_s9  ;;  %p595_p8 = scmp.lt.s32.totalorder %s589_s9, %s589_s9 }
  0x19   :  { %p596_p9 = por %p595_p8, %p594_p7 }
  0x1b   :  { %p597_p10 = pnand %p596_p9, %p590_p6 }
  0x1d   :  { %600 = shalt.err (!%p597_p10)
}
  0x1e   :  { %s678_s10 = smov 128   ;;  %s679_s11 = smov 8  }
  0x1f   :  { %39 = dma.hbm_to_vmem [thread:$0]  %s814_s2, 256, %s34_s26, [#allocation11], %s678_s10, %s678_s10, %s679_s11  }
  0x20   :  { %s601_s16 = scalar_lea.hbm %s813_s1, 256 }
  0x21   :  { %p602_p11 = scmp.ne.s32.totalorder %s813_s1, %s601_s16  ;;  %p605_p12 = scmp.lt.u32.totalorder %s601_s16, %s813_s1 }
  0x23   :  { %p607_p13 = pnand %p605_p12, %p602_p11 }
  0x25   :  { %610 = shalt.err (!%p607_p13)
}
  0x26   :  { %s611_s21 = scalar_lea.vmem %s723_s28, 256  ;;  %p616_p1 = scmp.lt.s32.totalorder %s723_s28, %s723_s28 }
  0x27   :  { %p612_p0 = scmp.ne.s32.totalorder %s723_s28, %s611_s21  ;;  %p617_p2 = scmp.lt.s32.totalorder %s611_s21, %s611_s21 }
  0x29   :  { %p618_p3 = por %p617_p2, %p616_p1 }
  0x2b   :  { %p619_p4 = pnand %p618_p3, %p612_p0 }
  0x2d   :  { %622 = shalt.err (!%p619_p4)
}
  0x2e   :  { %27 = dma.hbm_to_vmem [thread:$0]  %s813_s1, 256, %s723_s28, [#allocation8], %s678_s10, %s678_s10, %s679_s11  }
  0x2f   :  { %s680_s23 = smov [#allocation12]   ;;  %s623_s27 = scalar_lea.hbm %s815_s3, 256 }
  0x30   :  { %s45_s24 = sshll.u32 %s680_s23, 4  ;;  %p624_p5 = scmp.ne.s32.totalorder %s815_s3, %s623_s27  ;;  %s46_s24 = int_to_ptr.vmem [resolvable:$true] %s45_s24 }
  0x31   :  { %p627_p6 = scmp.lt.u32.totalorder %s623_s27, %s815_s3 }
  0x33   :  { %p629_p7 = pnand %p627_p6, %p624_p5 }
  0x35   :  { %632 = shalt.err (!%p629_p7)
}
  0x36   :  { %s633_s7 = scalar_lea.vmem %s46_s24, 256  ;;  %p638_p9 = scmp.lt.s32.totalorder %s46_s24, %s46_s24 }
  0x37   :  { %p634_p8 = scmp.ne.s32.totalorder %s46_s24, %s633_s7  ;;  %p639_p10 = scmp.lt.s32.totalorder %s633_s7, %s633_s7 }
  0x39   :  { %p640_p11 = por %p639_p10, %p638_p9 }
  0x3b   :  { %p641_p12 = pnand %p640_p11, %p634_p8 }
  0x3d   :  { %644 = shalt.err (!%p641_p12)
}
  0x3e   :  { %51 = dma.hbm_to_vmem [thread:$0]  %s815_s3, 256, %s46_s24, [#allocation11], %s678_s10, %s678_s10, %s679_s11  }
  0x3f   :  { %669 = dma.done.wait [#allocation8], 256  }
  0x40   :  { %670 = vsyncadd [#allocation8], 4294967040 }
  0x41   :  { %671 = dma.done.wait [#allocation11], 512  }
  0x42   :  { %672 = vsyncadd [#allocation11], 4294966784  ;;  %v681_v0 = vmov 0.0   ;;  %vm682_vm0 = vmmov 0   ;;  %vm80_vm1 = vcmask 261120   ;;  %v78_v1 = vld [vmem:[#allocation10] sm:$0xff]  ;;  %v72_v4 = vlaneseq }
  0x43   :  { %524 = vmatprep.subr.mxu0 %v681_v0  ;;  %526 = vmatprep.mubr.msk.f32.mxu0 %vm682_vm0, %v681_v0  ;;  %v77_v2 = vld [vmem:[#allocation7] sm:$0xff]  ;;  %vm65_vm2 = vcmask 7168   ;;  %v683_v3 = vmov -inf   ;;  %s159_s3 = sld [smem:[#allocation6]]  ;;  %vm164_vm4 = vcmask 64512   ;;  %v684_v12 = vmov 0  }
  0x44   :  { %529 = vmatprep.subr.mxu1 %v681_v0  ;;  %531 = vmatprep.mubr.msk.f32.mxu1 %vm682_vm0, %v681_v0  ;;  %66 = vst.msk [vmem:[#allocation2] sm:$0xff] %vm65_vm2, %v683_v3  ;;  %67 = vst.msk [vmem:[#allocation2 + $0x8] sm:$0xff] %vm65_vm2, %v683_v3  ;;  %v73_v5 = vand.u32 127, %v72_v4  ;;  %v79_v17 = vld [vmem:[#allocation12] sm:$0xff]  ;;  %v274_v21 = vld [vmem:[#allocation10 + $0x8] sm:$0xff]  ;;  %s514_s0 = sld [smem:[#allocation6 + $0x1]] }
  0x45   :  { %525 = vmatpush3.xpose.msk.msra.mxu0 %vm80_vm1, %v78_v1  ;;  %68 = vst.msk [vmem:[#allocation3] sm:$0xff] %vm65_vm2, %v681_v0  ;;  %69 = vst.msk [vmem:[#allocation3 + $0x8] sm:$0xff] %vm65_vm2, %v681_v0  ;;  %555 = vset.pattern.permute.xlu0 %v684_v12  ;;  %v272_v23 = vld [vmem:[#allocation7 + $0x8] sm:$0xff]  ;;  %s685_s8 = smov [#allocation13]  }
  0x46   :  { %539 = vmatprep.subr.mxu0 %v681_v0  ;;  %556 = vset.pattern.permute.xlu1 %v684_v12  ;;  %v276_v35 = vld [vmem:[#allocation12 + $0x8] sm:$0xff]  ;;  %s496_s9 = sshll.u32 %s685_s8, 4  ;;  %s497_s9 = int_to_ptr.vmem [resolvable:$true] %s496_s9 }
  0x47   :  { %530 = vmatpush3.msra.mxu1 %v79_v17  ;;  %s645_s12 = scalar_lea.vmem %s497_s9, 256  ;;  %p650_p0 = scmp.lt.s32.totalorder %s497_s9, %s497_s9 }
  0x48   :  { %527 = vmatmul.mubr.msk.f32.vlgmr.msra.gmra.mrb[0].mxu0 %vm80_vm1, %v77_v2  ;;  %534 = vmatprep.subr.mxu1 %v681_v0  ;;  %p646_p13 = scmp.ne.s32.totalorder %s497_s9, %s645_s12  ;;  %p651_p1 = scmp.lt.s32.totalorder %s645_s12, %s645_s12 }
  0x49   :  { %541 = vmatprep.mubr.msk.f32.mxu0 %vm682_vm0, %v681_v0  ;;  %v160_v6 = vstv %s159_s3  ;;  %540 = vmatpush3.msra.mxu0 %v276_v35 }
  0x4a   :  { %vm161_vm3 = vcmp.lt.s32.totalorder %v73_v5, %v160_v6  ;;  %v356_v26 = vstv %s514_s0  ;;  %p652_p2 = por %p651_p1, %p650_p0 }
  0x4b   :  { %v163_v13 = vld [vmem:[#allocation2] sm:$0xff]  ;;  %vm357_vm5 = vcmp.lt.s32.totalorder %v73_v5, %v356_v26  ;;  %v360_v32 = vld [vmem:[#allocation2 + $0x8] sm:$0xff] }
  0x4c   :  { %v180_v47 = vld [vmem:[#allocation3] sm:$0xff]  ;;  %v377_v53 = vld [vmem:[#allocation3 + $0x8] sm:$0xff]  ;;  %p653_p3 = pnand %p652_p2, %p646_p13 }
 0x11b   :  { %v153_v7 = vpop.f32.mrb[0].mxu0 }
 0x11c   :  { %v157_v8 = vmul.f32 0.17677669, %v153_v7  ;;  %v528_v9 = vpop.f32.mrb[1].mxu0 }
 0x11e   :  { %v162_v10 = vsel %vm161_vm3, %v157_v8, -1000000.0 }
 0x11f   :  { %v165_v11 = vsel %vm164_vm4, %v162_v10, -inf }
 0x120   :  { %166 = vmax.xlane.f32.xlu0 %v165_v11 }
 0x1ad   :  { %v167_v14 = vpop.xlane.xlu0 %166 }
 0x1ae   :  { %v168_v15 = vmax.f32 %v163_v13, %v167_v14 }
 0x1b0   :  { %v169_v16 = vsub.f32 %v163_v13, %v168_v15  ;;  %270 = vst.msk [vmem:[#allocation2] sm:$0xff] %vm65_vm2, %v168_v15  ;;  %174 = vperm.xlu0 %555, %v168_v15  }
 0x1b2   :  { %v170_v37 = vmul.f32 1.442695, %v169_v16 }
 0x22f   :  { %v175_v18 = vpop.permute.xlu0 %174 }
 0x230   :  { %v177_v19 = vsub.f32 %v162_v10, %v175_v18 }
 0x232   :  { %v178_v20 = vmul.f32 1.442695, %v177_v19 }
 0x234   :  { %557 = vpow2.f32 %v178_v20 }
 0x235   :  { %559 = vpow2.f32 %v170_v37 }
 0x23e   :  { %v558_v22 = vpop.eup %557 }
 0x23f   :  { %532 = vmatmul.mubr.msk.f32.vlgmr.msra.gmra.mrb[0].mxu1 %vm164_vm4, %v558_v22  ;;  %v182_v36 = vsel %vm164_vm4, %v558_v22, 0.0  ;;  %v560_v40 = vpop.eup %559 }
 0x240   :  { %535 = vmatpush3.xpose.msk.msra.mxu1 %vm80_vm1, %v274_v21  ;;  %536 = vmatprep.mubr.msk.f32.mxu1 %vm682_vm0, %v681_v0  ;;  %v181_v48 = vmul.f32 %v560_v40, %v180_v47 }
 0x243   :  { %537 = vmatmul.mubr.msk.f32.vlgmr.msra.gmra.mrb[2].mxu1 %vm80_vm1, %v272_v23 }
 0x312   :  { %v264_v24 = vpop.f32.mrb[0].mxu1 }
 0x313   :  { %v533_v25 = vpop.f32.mrb[1].mxu1 }
 0x316   :  { %v349_v27 = vpop.f32.mrb[2].mxu1 }
 0x317   :  { %v353_v28 = vmul.f32 0.17677669, %v349_v27  ;;  %v538_v29 = vpop.f32.mrb[3].mxu1 }
 0x319   :  { %v358_v30 = vsel %vm357_vm5, %v353_v28, -1000000.0 }
 0x31a   :  { %v361_v31 = vsel %vm164_vm4, %v358_v30, -inf }
 0x31b   :  { %362 = vmax.xlane.f32.xlu1 %v361_v31 }
 0x3a8   :  { %v363_v33 = vpop.xlane.xlu1 %362 }
 0x3a9   :  { %v364_v34 = vmax.f32 %v360_v32, %v363_v33 }
 0x3ab   :  { %467 = vst.msk [vmem:[#allocation2 + $0x8] sm:$0xff] %vm65_vm2, %v364_v34  ;;  %370 = vperm.xlu1 %556, %v364_v34   ;;  %v365_v38 = vsub.f32 %v360_v32, %v364_v34 }
 0x3ad   :  { %v366_v39 = vmul.f32 1.442695, %v365_v38 }
 0x3af   :  { %561 = vpow2.f32 %v366_v39 }
 0x3b9   :  { %v562_v41 = vpop.eup %561 }
 0x3ba   :  { %v378_v54 = vmul.f32 %v562_v41, %v377_v53 }
 0x3cf   :  { %183 = vadd.xlane.f32.xlu1 %v182_v36 }
 0x3e0   :  { %191 = vperm.xlu1 %556, %v560_v40  }
 0x3e4   :  { %388 = vperm.xlu1 %556, %v562_v41  }
 0x42a   :  { %v371_v42 = vpop.permute.xlu1 %370 }
 0x42b   :  { %v373_v43 = vsub.f32 %v358_v30, %v371_v42 }
 0x42d   :  { %v374_v44 = vmul.f32 1.442695, %v373_v43 }
 0x42f   :  { %563 = vpow2.f32 %v374_v44 }
 0x439   :  { %v564_v45 = vpop.eup %563 }
 0x43a   :  { %542 = vmatmul.mubr.msk.f32.vlgmr.msra.gmra.mrb[2].mxu0 %vm164_vm4, %v564_v45  ;;  %v379_v46 = vsel %vm164_vm4, %v564_v45, 0.0 }
 0x43b   :  { %380 = vadd.xlane.f32.xlu0 %v379_v46 }
 0x45c   :  { %v184_v49 = vpop.xlane.xlu1 %183 }
 0x45d   :  { %v185_v50 = vadd.f32 %v184_v49, %v181_v48 }
 0x45f   :  { %187 = vst.msk [vmem:[#allocation3] sm:$0xff] %vm65_vm2, %v185_v50 }
 0x460   :  { %v192_v59 = vpop.permute.xlu1 %191 }
 0x461   :  { %v194_v60 = vmul.f32 0.0, %v192_v59 }
 0x463   :  { %v268_v62 = vadd.f32 %v264_v24, %v194_v60 }
 0x464   :  { %v389_v61 = vpop.permute.xlu1 %388 }
 0x465   :  { %v391_v3 = vmul.f32 0.0, %v389_v61 }
 0x466   :  { %v471_v51 = vld [vmem:[#allocation3] sm:$0xff] }
 0x467   :  { %565 = vrcp.f32 %v471_v51 }
 0x471   :  { %v566_v52 = vpop.eup %565 }
 0x472   :  { %479 = vperm.xlu1 %556, %v566_v52  }
 0x4c8   :  { %v381_v55 = vpop.xlane.xlu0 %380 }
 0x4c9   :  { %v382_v56 = vadd.f32 %v381_v55, %v378_v54 }
 0x4cb   :  { %383 = vst.msk [vmem:[#allocation3 + $0x8] sm:$0xff] %vm65_vm2, %v382_v56 }
 0x4d2   :  { %v472_v57 = vld [vmem:[#allocation3 + $0x8] sm:$0xff] }
 0x4d3   :  { %567 = vrcp.f32 %v472_v57 }
 0x4dd   :  { %v568_v58 = vpop.eup %567 }
 0x4de   :  { %484 = vperm.xlu0 %555, %v568_v58  }
 0x4f1   :  { %v480_v63 = vpop.permute.xlu1 %479 }
 0x4f2   :  { %v487_v0 = vmul.f32 %v480_v63, %v268_v62 }
 0x4f4   :  { %489 = vst [vmem:[#allocation13] sm:$0xff] %v487_v0 }
 0x50d   :  { %v461_v1 = vpop.f32.mrb[2].mxu0 }
 0x50e   :  { %v543_v2 = vpop.f32.mrb[3].mxu0  ;;  %v465_v4 = vadd.f32 %v461_v1, %v391_v3 }
 0x55d   :  { %v485_v5 = vpop.permute.xlu0 %484 }
 0x55e   :  { %v488_v6 = vmul.f32 %v485_v5, %v465_v4 }
 0x560   :  { %490 = vst [vmem:[#allocation13 + $0x8] sm:$0xff] %v488_v6 }
 0x561   :  { %656 = shalt.err (!%p653_p3)
}
 0x562   :  { %s657_s15 = scalar_lea.hbm %s816_s4, 256 }
 0x563   :  { %p658_p4 = scmp.ne.s32.totalorder %s816_s4, %s657_s15  ;;  %p661_p5 = scmp.lt.u32.totalorder %s657_s15, %s816_s4 }
 0x565   :  { %p663_p6 = pnand %p661_p5, %p658_p4 }
 0x567   :  { %666 = shalt.err (!%p663_p6)
}
 0x568   :  { %502 = dma.vmem_to_hbm [thread:$0]  %s497_s9, 256, %s816_s4, [#allocation9], %s678_s10, %s678_s10, %s679_s11  }
 0x569   :  { %673 = dma.done.wait [#allocation9], 256  }
 0x56a   :  { %674 = vsyncadd [#allocation9], 4294967040 }
 0x56b   :  { %506 = vsyncpa [#allocation8], 1 }
 0x56c   :  { %507 = vsyncpa [#allocation11], 1 }
 0x56d   :  { %508 = vsyncpa [#allocation9], 1 }

</bundles_post_ra>
